<compile_context>
chip_gen: v5e
topology: v5e:2x2
jax: 0.10.0
libtpu: 0.0.40
codegen_flags: <defaults>
</compile_context>

<pallas_src>
import jax
import jax.numpy as jnp
from jax.experimental import pallas as pl
from jax.experimental.pallas import tpu as pltpu


def _round_up(x, m):
    return ((x + m - 1) // m) * m


def _halve_tile(v, mult, floor):
    """Halve a tile size while keeping it a multiple of `mult` and >= `floor`."""
    return max(floor, ((v // 2) // mult) * mult)


def _vmem_budget_bytes():
    """~3/4 of physical VMEM: ~48 MiB on v7x (64 MiB/TC), ~96 MiB on v5e/v6e (128 MiB)."""
    try:
        cap = pltpu.get_tpu_info().vmem_capacity_bytes
    except Exception:
        cap = 64 << 20          # conservative fallback (v7x-sized)
    return int(cap * 3 // 4)


# ---------------------------------------------------------------------------
# Kernels: out[o, hw] = W[o, :] @ patches[:, hw] (+ bias[o])
# ---------------------------------------------------------------------------
def _masked_gemm_single_kernel(w_ref, p_ref, b_ref, o_ref):
    # Whole K resident -> single MXU dot, no accumulator scratch, no RMW, no pl.when.
    acc = jnp.dot(w_ref[...], p_ref[...], preferred_element_type=jnp.float32)
    o_ref[...] = (acc + b_ref[...]).astype(o_ref.dtype)


def _masked_gemm_acc_kernel(w_ref, p_ref, b_ref, o_ref, acc_ref):
    # K-tiled GEMM with f32 VMEM accumulator; bias folded into the k==0 init so the
    # finalize step is a pure cast+store.
    k = pl.program_id(3)

    @pl.when(k == 0)
    def _():
        acc_ref[...] = jnp.broadcast_to(b_ref[...], acc_ref.shape)

    acc_ref[...] += jnp.dot(w_ref[...], p_ref[...], preferred_element_type=jnp.float32)

    @pl.when(k == pl.num_programs(3) - 1)
    def _():
        o_ref[...] = acc_ref[...].astype(o_ref.dtype)


# ---------------------------------------------------------------------------
# GetSubnet: rank-based binary mask, implemented as sort + threshold compare
# (pure VPU compare, no serialized scatter).  Stays in plain JAX (glue): there is
# no TPU-Pallas global-sort primitive.
# Note: tie-handling at the cutoff value can differ from torch.sort's rank-based
# selection when several |scores| equal the threshold exactly (edge case only).
# ---------------------------------------------------------------------------
def get_subnet(scores, k):
    flat = scores.reshape(-1)
    n = flat.shape[0]
    j = int((1.0 - float(k)) * n)          # static, mirrors PyTorch int()
    if j <= 0:
        return jnp.ones(scores.shape, scores.dtype)
    if j >= n:
        return jnp.zeros(scores.shape, scores.dtype)
    thresh = jnp.sort(flat)[j]             # j-th smallest |score|
    return (scores >= thresh).astype(scores.dtype)


# ---------------------------------------------------------------------------
# im2col (wrapper-side JAX glue, bf16, transpose-free):
#   NCHW x -> patches of shape (N, K=C*KH*KW, HW=Ho*Wo) with HW as the minor dim.
# K ordering (c-major, then kh, kw) matches weight.reshape(O, C*KH*KW).
# ---------------------------------------------------------------------------
def _im2col_k_major(x, kh, kw, stride, padding, dilation, dtype):
    n, c, h, w = x.shape
    sh, sw = stride
    ph, pw = padding
    dh, dw = dilation
    ho = (h + 2 * ph - dh * (kh - 1) - 1) // sh + 1
    wo = (w + 2 * pw - dw * (kw - 1) - 1) // sw + 1
    # Cast to compute dtype BEFORE pad/stack -> half the materialized HBM bytes.
    xp = jnp.pad(x.astype(dtype), ((0, 0), (0, 0), (ph, ph), (pw, pw)))
    taps = []
    for i in range(kh):
        for j in range(kw):
            taps.append(xp[:, :,
                           i * dh: i * dh + sh * (ho - 1) + 1: sh,
                           j * dw: j * dw + sw * (wo - 1) + 1: sw])   # (N, C, Ho, Wo)
    col = jnp.stack(taps, axis=2)                 # (N, C, KH*KW, Ho, Wo) -- no transpose
    return col.reshape(n, c * kh * kw, ho * wo), (ho, wo)


# ---------------------------------------------------------------------------
# Wrapper: SubnetConv.forward
# ---------------------------------------------------------------------------
def subnet_conv_forward(x, weight, popup_scores, bias=None, *,
                        stride=(1, 1), padding=(1, 1), dilation=(1, 1), groups=1,
                        top_k=1.0, tile_o=256, tile_hw=1024, tile_k=1024,
                        collapse_k=True, compute_dtype=jnp.bfloat16):
    if groups != 1:
        # TODO(synk): grouped conv not implemented (module's example layers use groups=1).
        raise NotImplementedError("groups != 1 not supported")

    O, C, KH, KW = weight.shape
    N = x.shape[0]
    if bias is None:
        bias = jnp.zeros((O,), dtype=jnp.float32)

    # Popup-score subnet mask applied ONCE in the wrapper (grid-invariant work).
    adj = get_subnet(jnp.abs(popup_scores), top_k)
    K = C * KH * KW
    w2d = (weight * adj).reshape(O, K).astype(compute_dtype)          # (O, K)

    patches, (ho, wo) = _im2col_k_major(x, KH, KW, stride, padding, dilation, compute_dtype)
    HW = ho * wo

    # ---- tile-size selection -------------------------------------------------
    in_b = jnp.dtype(compute_dtype).itemsize
    out_b = jnp.dtype(x.dtype).itemsize
    K128 = _round_up(K, 128)
    HW128 = _round_up(HW, 128)
    O16 = _round_up(O, 16)

    tile_o = min(_round_up(tile_o, 16), O16)
    tile_hw = min(_round_up(tile_hw, 128), HW128)
    tile_k = min(_round_up(tile_k, 128), K128)

    budget = _vmem_budget_bytes()
    headroom = 2 << 20

    def est(to, tk, thw, multi_k):
        b = (2 * to * tk * in_b            # weight tiles (double-buffered)
             + 2 * tk * thw * in_b         # patch tiles
             + 2 * to * thw * out_b        # output tiles
             + 2 * to * 4)                 # bias column
        if multi_k:
            b += to * thw * 4              # f32 accumulator scratch
        return b

    # Collapse the K grid axis entirely whenever the full K fits the VMEM budget:
    # one dot per output tile, no accumulator RMW, no repeated weight-tile DMAs.
    if collapse_k and est(tile_o, K128, tile_hw, False) + headroom <= budget:
        tile_k = K128

    # Shrink-to-fit, keeping every tile a lane-dense multiple of 128 (16 for O).
    while est(tile_o, tile_k, tile_hw, tile_k < K128) + headroom > budget:
        if tile_hw > 128:
            tile_hw = _halve_tile(tile_hw, 128, 128)
        elif tile_k > 128:
            tile_k = _halve_tile(tile_k, 128, 128)
        else:
            break

    # v7x has 2 TensorCores sharded over the "parallel" grid axes: make sure the
    # parallel portion of the grid has >= 2 tiles so neither core idles.
    if N * pl.cdiv(O16, tile_o) * pl.cdiv(HW128, tile_hw) < 2:
        if HW128 > 128:
            tile_hw = _halve_tile(tile_hw, 128, 128)
        elif O16 > 16 and (tile_o // 2) % 16 == 0:
            tile_o = tile_o // 2

    K_pad = _round_up(K128, tile_k)
    HW_pad = _round_up(HW128, tile_hw)
    O_pad = _round_up(O16, tile_o)
    multi_k = K_pad > tile_k
    k_tiles = K_pad // tile_k
    o_tiles = O_pad // tile_o
    hw_tiles = HW_pad // tile_hw

    # Zero padding: padded K/O/HW contributions are exactly 0 and sliced off below.
    w_p = jnp.pad(w2d, ((0, O_pad - O), (0, K_pad - K)))
    patches_p = jnp.pad(patches, ((0, 0), (0, K_pad - K), (0, HW_pad - HW)))
    bias_col = jnp.pad(bias.astype(jnp.float32), (0, O_pad - O)).reshape(O_pad, 1)

    vmem_limit = int(min(budget,
                         max(est(tile_o, tile_k, tile_hw, multi_k) + headroom, 16 << 20)))
    cost = pl.CostEstimate(
        flops=2 * N * O_pad * HW_pad * K_pad,
        transcendentals=0,
        bytes_accessed=int(w_p.size * in_b + patches_p.size * in_b
                           + N * O_pad * HW_pad * out_b + bias_col.size * 4),
    )

    if multi_k:
        grid = (N, o_tiles, hw_tiles, k_tiles)
        in_specs = [
            pl.BlockSpec((tile_o, tile_k), lambda n, o, hw, k: (o, k)),            # W
            pl.BlockSpec((None, tile_k, tile_hw), lambda n, o, hw, k: (n, k, hw)),  # patches
            pl.BlockSpec((tile_o, 1), lambda n, o, hw, k: (o, 0)),                  # bias
        ]
        out_spec = pl.BlockSpec((None, tile_o, tile_hw), lambda n, o, hw, k: (n, o, hw))
        scratch = [pltpu.VMEM((tile_o, tile_hw), jnp.float32)]
        kernel = _masked_gemm_acc_kernel
        semantics = ("parallel", "parallel", "parallel", "arbitrary")
    else:
        grid = (N, o_tiles, hw_tiles)
        in_specs = [
            pl.BlockSpec((tile_o, tile_k), lambda n, o, hw: (o, 0)),
            pl.BlockSpec((None, tile_k, tile_hw), lambda n, o, hw: (n, 0, hw)),
            pl.BlockSpec((tile_o, 1), lambda n, o, hw: (o, 0)),
        ]
        out_spec = pl.BlockSpec((None, tile_o, tile_hw), lambda n, o, hw: (n, o, hw))
        scratch = []
        kernel = _masked_gemm_single_kernel
        semantics = ("parallel", "parallel", "parallel")

    out3d = pl.pallas_call(
        kernel,
        out_shape=jax.ShapeDtypeStruct((N, O_pad, HW_pad), x.dtype),
        grid_spec=pltpu.PrefetchScalarGridSpec(
            num_scalar_prefetch=0,
            grid=grid,
            in_specs=in_specs,
            out_specs=out_spec,
            scratch_shapes=scratch,
        ),
        compiler_params=pltpu.CompilerParams(
            dimension_semantics=semantics,
            vmem_limit_bytes=vmem_limit),
        cost_estimate=cost,
    )(w_p, patches_p, bias_col)

    # (N, O_pad, HW_pad) -> NCHW directly: no activation transpose needed.
    return out3d[:, :O, :HW].reshape(N, O, ho, wo)


# ---------------------------------------------------------------------------
# Reference (plain JAX, f32) for verification
# ---------------------------------------------------------------------------
def reference_forward(x, weight, popup_scores, bias, *,
                      stride=(1, 1), padding=(1, 1), dilation=(1, 1), top_k=1.0):
    adj = get_subnet(jnp.abs(popup_scores), top_k)
    w = weight * adj
    y = jax.lax.conv_general_dilated(
        x, w, window_strides=stride,
        padding=[(padding[0], padding[0]), (padding[1], padding[1])],
        rhs_dilation=dilation,
        dimension_numbers=("NCHW", "OIHW", "NCHW"))
    return y + bias[None, :, None, None]


if __name__ == "__main__":
    key = jax.random.PRNGKey(0)
    k_x, k_w, k_s, k_b = jax.random.split(key, 4)

    # Small Conv2d matching the module: in=4, out=8, kernel 3x3.
    N, C, H, W = 2, 4, 16, 16
    O, KH, KW = 8, 3, 3
    x = jax.random.normal(k_x, (N, C, H, W), dtype=jnp.float32)
    weight = jax.random.normal(k_w, (O, C, KH, KW), dtype=jnp.float32) * 0.1
    popup_scores = jax.random.normal(k_s, (O, C, KH, KW), dtype=jnp.float32)
    bias = jax.random.normal(k_b, (O,), dtype=jnp.float32) * 0.1

    def close(a, b, atol, rtol):
        return bool(jnp.allclose(a, b, atol=atol, rtol=rtol))

    # 1) stride 1 / padding 1, top_k in {1.0, 0.5}  (bf16 MXU inputs, f32 accumulation)
    for top_k in (1.0, 0.5):
        y = jax.block_until_ready(
            subnet_conv_forward(x, weight, popup_scores, bias,
                                stride=(1, 1), padding=(1, 1), dilation=(1, 1),
                                top_k=top_k))
        y_ref = reference_forward(x, weight, popup_scores, bias,
                                  stride=(1, 1), padding=(1, 1), dilation=(1, 1),
                                  top_k=top_k)
        assert y.shape == (N, O, H, W), y.shape
        assert close(y, y_ref, 2e-2, 2e-2), f"mismatch (stride 1, top_k={top_k})"

    # 2) stride 2 / padding 1 (exercises the strided im2col path)
    y = jax.block_until_ready(
        subnet_conv_forward(x, weight, popup_scores, bias,
                            stride=(2, 2), padding=(1, 1), dilation=(1, 1), top_k=0.5))
    y_ref = reference_forward(x, weight, popup_scores, bias,
                              stride=(2, 2), padding=(1, 1), dilation=(1, 1), top_k=0.5)
    assert y.shape == (N, O, H // 2, W // 2), y.shape
    assert close(y, y_ref, 2e-2, 2e-2), "mismatch (stride 2)"

    # 3) larger channel count with a small explicit tile_k and collapse disabled
    #    -> exercises the K-tiled accumulator kernel (f32 compute, tight tolerance).
    C2, O2 = 64, 32
    x2 = jax.random.normal(k_x, (1, C2, 16, 16), dtype=jnp.float32)
    w2 = jax.random.normal(k_w, (O2, C2, KH, KW), dtype=jnp.float32) * 0.05
    s2 = jax.random.normal(k_s, (O2, C2, KH, KW), dtype=jnp.float32)
    b2 = jax.random.normal(k_b, (O2,), dtype=jnp.float32) * 0.1
    y = jax.block_until_ready(
        subnet_conv_forward(x2, w2, s2, b2, stride=(1, 1), padding=(1, 1),
                            dilation=(1, 1), top_k=0.5, tile_k=256,
                            collapse_k=False, compute_dtype=jnp.float32))
    y_ref = reference_forward(x2, w2, s2, b2, stride=(1, 1), padding=(1, 1),
                              dilation=(1, 1), top_k=0.5)
    assert y.shape == (1, O2, 16, 16), y.shape
    assert close(y, y_ref, 1e-3, 1e-3), "mismatch (K-tiled accumulator path)"

    print("KERNEL_OK")
</pallas_src>

<mosaic_0001>
module attributes {stable_mosaic.version = 11 : i64} {
  func.func @_masked_gemm_single_kernel(%arg0: i32, %arg1: i32, %arg2: i32, %arg3: memref<16x128xbf16, #tpu.memory_space<vmem>>, %arg4: memref<1x128x256xbf16, #tpu.memory_space<vmem>>, %arg5: memref<16x1xf32, #tpu.memory_space<vmem>>, %arg6: memref<1x16x256xf32, #tpu.memory_space<vmem>>) attributes {dimension_semantics = [#tpu.dimension_semantics<parallel>, #tpu.dimension_semantics<parallel>, #tpu.dimension_semantics<parallel>], iteration_bounds = array<i64: 2, 1, 1>, scalar_prefetch = 0 : i64, scratch_operands = 0 : i64, tpu.core_type = #tpu.core_type<tc>, window_params = [{transform_indices = @transform_0, window_bounds = array<i64: 16, 128>}, {transform_indices = @transform_1, window_bounds = array<i64: 1, 128, 256>}, {transform_indices = @transform_2, window_bounds = array<i64: 16, 1>}, {transform_indices = @transform_3, window_bounds = array<i64: 1, 16, 256>}]} {
    %c0 = arith.constant 0 : index
    %c0_0 = arith.constant 0 : index
    %0 = vector.load %arg3[%c0, %c0_0] : memref<16x128xbf16, #tpu.memory_space<vmem>>, vector<16x128xbf16>
    %c0_1 = arith.constant 0 : index
    %c0_2 = arith.constant 0 : index
    %c0_3 = arith.constant 0 : index
    %1 = vector.load %arg4[%c0_1, %c0_2, %c0_3] : memref<1x128x256xbf16, #tpu.memory_space<vmem>>, vector<1x128x256xbf16>
    %2 = vector.shape_cast %1 : vector<1x128x256xbf16> to vector<128x256xbf16>
    %cst = arith.constant dense<0.000000e+00> : vector<16x256xf32>
    %3 = tpu.matmul %0, %2, %cst {dimension_numbers = #tpu.dot_dimension_numbers<[1], [0], [0], [1], [0, 0, 1, 1], [], []>} : vector<16x128xbf16>, vector<128x256xbf16>, vector<16x256xf32> -> vector<16x256xf32>
    %c0_4 = arith.constant 0 : index
    %c0_5 = arith.constant 0 : index
    %4 = vector.load %arg5[%c0_4, %c0_5] : memref<16x1xf32, #tpu.memory_space<vmem>>, vector<16x1xf32>
    %5 = vector.broadcast %4 : vector<16x1xf32> to vector<16x256xf32>
    %6 = arith.addf %3, %5 : vector<16x256xf32>
    %c0_6 = arith.constant 0 : index
    %c0_7 = arith.constant 0 : index
    %c0_8 = arith.constant 0 : index
    %7 = vector.load %arg6[%c0_6, %c0_7, %c0_8] : memref<1x16x256xf32, #tpu.memory_space<vmem>>, vector<1x16x256xf32>
    %8 = vector.shape_cast %7 : vector<1x16x256xf32> to vector<16x256xf32>
    %9 = vector.shape_cast %6 : vector<16x256xf32> to vector<1x16x256xf32>
    tpu.vector_store %arg6[%c0_6, %c0_7, %c0_8], %9 {strides = array<i32>} : memref<1x16x256xf32, #tpu.memory_space<vmem>>, vector<1x16x256xf32>,
    return
  }
  func.func @transform_0(%arg0: i32, %arg1: i32, %arg2: i32) -> (i32, i32) {
    %c0_i32 = arith.constant 0 : i32
    %c0_i32_0 = arith.constant 0 : i32
    return %arg1, %c0_i32 : i32, i32
  }
  func.func @transform_1(%arg0: i32, %arg1: i32, %arg2: i32) -> (i32, i32, i32) {
    %c0_i32 = arith.constant 0 : i32
    %c0_i32_0 = arith.constant 0 : i32
    return %arg0, %c0_i32, %arg2 : i32, i32, i32
  }
  func.func @transform_2(%arg0: i32, %arg1: i32, %arg2: i32) -> (i32, i32) {
    %c0_i32 = arith.constant 0 : i32
    %c0_i32_0 = arith.constant 0 : i32
    return %arg1, %c0_i32 : i32, i32
  }
  func.func @transform_3(%arg0: i32, %arg1: i32, %arg2: i32) -> (i32, i32, i32) {
    %c0_i32 = arith.constant 0 : i32
    return %arg0, %arg1, %arg2 : i32, i32, i32
  }
}

</mosaic_0001>

<bundles_post_ra>
// kernel: tpu_custom_call.1
= control target key start
LH: loop header
LB: loop body
LE: loop exit
PB: predicated region body
PF: predicated region fallthrough
CT: control target
= control target key end

     0   :  { %8 = vsyncpa [#allocation3], 0  ;;  %s1031_s0 = inlined_call_operand.vmem [shape: bf16[16,128], index: 0, kind: input, shape index: {}]   ;;  %s1032_s1 = inlined_call_operand.hbm [shape: bf16[2,128,256], index: 1, kind: input, shape index: {}]   ;;  %s1033_s2 = inlined_call_operand.vmem [shape: f32[16,1], index: 2, kind: input, shape index: {}]   ;;  %s1034_s3 = inlined_call_operand.hbm [shape: f32[2,16,256], index: 3, kind: output, shape index: {}]  }
   0x1   :  { %10 = vsyncpa [#allocation3 + $0x1], 0 }
   0x2   :  { %11 = vsyncpa [#allocation4], 0 }
   0x3   :  { %13 = vsyncpa [#allocation4 + $0x1], 0  ;;  %s867_s12 = smov 0   ;;  %s869_s13 = smov 0  }
   0x4   :  { %s871_s14 = smov 0   ;;  %s873_s15 = smov 0  }
   0x5   :  { %s875_s16 = smov 0   ;;  %s877_s17 = smov 0  }
   0x6 LB: > { %s556_s18 = sadd.s32 4294967295, %s840_s17   ;;  %s557_s19 = sadd.s32 4294967294, %s840_s17   ;;  %s840_s17 = sphi %s877_s17, %s19_s17   ;;  %s836_s16 = sphi %s875_s16, %s1043_s16   ;;  %s832_s15 = sphi %s873_s15, %s1042_s15   ;;  %s828_s14 = sphi %s871_s14, %s1041_s14   ;;  %s824_s13 = sphi %s869_s13, %s1040_s13   ;;  %s820_s12 = sphi %s867_s12, %s1039_s12  }
   0x7   : > { %s38_s20 = sadd.s32 1, %s836_s16  ;;  %s73_s21 = sadd.s32 1, %s828_s14 }
   0x8   : > { %p40_p0 = scmp.ge.s32.totalorder %s38_s20, 2  ;;  %p80_p1 = scmp.ne.s32.totalorder %s828_s14, %s824_s13 }
   0x9   : > { %p81_p2 = scmp.eq.s32.totalorder %s840_s17, 0  ;;  %p86_p3 = scmp.ne.s32.totalorder %s824_s13, %s820_s12 }
   0xa   : > { %s1045_s20 = smov (%p40_p0, %s38_s20), 0  ;;  %p87_p5 = scmp.eq.s32.totalorder %s556_s18, 0 }
   0xb   : > { %p908_p4 = por %p81_p2, %p80_p1  ;;  %s68_s23 = ssub.s32 %s836_s16, %s1045_s20 }
   0xc   : > { %p140_p6 = scmp.eq.s32.totalorder %s556_s18, 1  ;;  %p71_p7 = scmp.eq.s32.totalorder %s68_s23, 0 }
   0xd   : > { %p914_p8 = por %p87_p5, %p86_p3  ;;  %p146_p10 = scmp.eq.s32.totalorder %s557_s19, 1 }
   0xe   : > { %p918_p9 = por %p140_p6, %p80_p1  ;;  %p561_p12 = scmp.ge.s32.totalorder %s840_s17, 2 }
   0xf   : > { %s923_s26 = scalar_select %p71_p7, %s828_s14, %s73_s21  }
  0x10   : > { %p925_p11 = por %p146_p10, %p86_p3  ;;  %p672_p13 = scmp.lt.s32.totalorder %s840_s17, 2 }
  0x11   : > { %s184_s28 = sand.u32 1, %s828_s14   ;;  %s641_s30 = sshll.u32 %s836_s16, 7 }
  0x12   : > { %s562_s29 = sshll.u32 %s184_s28, 7  ;;  %s195_s6 = scalar_lea.hbm %s1032_s1, %s641_s30 }
  0x13   : > { %s188_s7 = scalar_lea.vmem [#allocation2], %s562_s29  ;;  %s196_s9 = sshll.u32 %s195_s6, 4  ;;  %s197_s9 = int_to_ptr.hbm [resolvable:$true] %s196_s9 }
  0x14   : > { %s198_s8 = sshll.u32 %s188_s7, 4  ;;  %p665_p0 = pnand %p672_p13, %p908_p4  ;;  %s199_s8 = int_to_ptr.vmem [resolvable:$true] %s198_s8 }
  0x15   : > { %p565_p1 = scmp.ge.s32.totalorder %s840_s17, 1  ;;  %s185_s10 = scalar_lea.sflag [#allocation3], %s184_s28 }
  0x16   : > { %s842_s11 = smov 128   ;;  %s843_s18 = smov 8  }
  0x17   : > { %667 = dma.hbm_to_vmem [thread:$0]  (!%p665_p0), %s197_s9, 2048, %s199_s8, %s185_s10, %s842_s11, %s842_s11, %s843_s18  }
  0x18   : > { %p206_p2 = scmp.lt.s32.totalorder %s840_s17, 3 }
  0x1a   : > { %p207_p3 = pnand %p565_p1, %p206_p2 }
  0x1b   : > { %s941_s19 = sand.u32 (!%p207_p3), 1, %s824_s13  }
  0x1c   : > { %210 = sbr.rel (%p207_p3) target bundleno = 209 (0xd1), region = 32  ;;  %s566_s21 = sshll.u32 (!%p207_p3), %s941_s19, 7 }
  0x1d   : > { %s213_s23 = scalar_lea.sflag (!%p207_p3), [#allocation3], %s941_s19  ;;  %s945_s29 = scalar_lea.vmem (!%p207_p3), [#allocation2], %s566_s21 }
  0x21   : > { %811 = dma.done.wait (%p914_p8), %s213_s23, 2048  }
  0x22   : > { %813 = vsyncadd (%p914_p8), %s213_s23, 4294965248  ;;  %v630_v0 = vld [vmem:[%s945_s29 + $0x70] sm:$0xf]  ;;  %v658_v1 = vld [vmem:[%s945_s29 + $0x74] sm:$0xf0]  ;;  %v844_v23 = vmov 0  }
  0x23   : > { %v657_v2 = vld [vmem:[%s945_s29 + $0x74] sm:$0xf]  ;;  %v631_v3 = vor.u32 %v658_v1, %v630_v0  ;;  %v632_v4 = vld [vmem:[%s945_s29 + $0x78] sm:$0xf0]  ;;  %v622_v5 = vld [vmem:[%s945_s29 + $0x60] sm:$0xf]  ;;  %727 = vset.pattern.permute.xlu0 %v844_v23 }
  0x24   : > { %v656_v6 = vld [vmem:[%s945_s29 + $0x64] sm:$0xf0]  ;;  %v635_v7 = vor.u32 %v657_v2, %v632_v4  ;;  %v655_v8 = vld [vmem:[%s945_s29 + $0x64] sm:$0xf]  ;;  %v624_v9 = vld [vmem:[%s945_s29 + $0x68] sm:$0xf0] }
  0x25   : > { %381 = vmatpush.bf16.msra.mxu0 %v631_v3  ;;  %v623_v10 = vor.u32 %v656_v6, %v622_v5  ;;  %v627_v11 = vor.u32 %v655_v8, %v624_v9  ;;  %v614_v12 = vld [vmem:[%s945_s29 + $0x50] sm:$0xf]  ;;  %v654_v13 = vld [vmem:[%s945_s29 + $0x54] sm:$0xf0]  ;;  %v653_v14 = vld [vmem:[%s945_s29 + $0x54] sm:$0xf] }
  0x26   : > { %395 = vmatpush.bf16.msra.mxu1 %v635_v7  ;;  %v616_v15 = vld [vmem:[%s945_s29 + $0x58] sm:$0xf0]  ;;  %v615_v16 = vor.u32 %v654_v13, %v614_v12  ;;  %v606_v18 = vld [vmem:[%s945_s29 + $0x40] sm:$0xf]  ;;  %v652_v19 = vld [vmem:[%s945_s29 + $0x44] sm:$0xf0] }
  0x27   : > { %v619_v17 = vor.u32 %v653_v14, %v616_v15  ;;  %v651_v20 = vld [vmem:[%s945_s29 + $0x44] sm:$0xf]  ;;  %v608_v21 = vld [vmem:[%s945_s29 + $0x48] sm:$0xf0]  ;;  %v607_v22 = vor.u32 %v652_v19, %v606_v18  ;;  %v598_v26 = vld [vmem:[%s945_s29 + $0x30] sm:$0xf] }
  0x28   : > { %v283_v24 = vld [vmem:[%s1033_s2] sm:$0xff]  ;;  %v611_v25 = vor.u32 %v651_v20, %v608_v21  ;;  %v650_v27 = vld [vmem:[%s945_s29 + $0x34] sm:$0xf0]  ;;  %v649_v28 = vld [vmem:[%s945_s29 + $0x34] sm:$0xf]  ;;  %s567_s6 = sshll.u32 %s941_s19, 5 }
  0x29   : > { %382 = vmatpush.bf16.msra.mxu0 %v623_v10  ;;  %287 = vperm.xlu0 %727, %v283_v24   ;;  %v600_v29 = vld [vmem:[%s945_s29 + $0x38] sm:$0xf0]  ;;  %v599_v30 = vor.u32 %v650_v27, %v598_v26  ;;  %v590_v32 = vld [vmem:[%s945_s29 + $0x20] sm:$0xf]  ;;  %v648_v33 = vld [vmem:[%s945_s29 + $0x24] sm:$0xf0] }
  0x2a   : > { %396 = vmatpush.bf16.msra.mxu1 %v627_v11  ;;  %v603_v31 = vor.u32 %v649_v28, %v600_v29  ;;  %v647_v34 = vld [vmem:[%s945_s29 + $0x24] sm:$0xf]  ;;  %v592_v35 = vld [vmem:[%s945_s29 + $0x28] sm:$0xf0]  ;;  %v591_v37 = vor.u32 %v648_v33, %v590_v32  ;;  %v582_v39 = vld [vmem:[%s945_s29 + $0x10] sm:$0xf] }
  0x2b   : > { %v284_v36 = vld [vmem:[%s1033_s2 + $0x8] sm:$0xff]  ;;  %v595_v38 = vor.u32 %v647_v34, %v592_v35  ;;  %v646_v40 = vld [vmem:[%s945_s29 + $0x14] sm:$0xf0]  ;;  %v645_v41 = vld [vmem:[%s945_s29 + $0x14] sm:$0xf]  ;;  %s659_s7 = sshll.u32 %s832_s15, 5 }
  0x2c   : > { %v584_v42 = vld [vmem:[%s945_s29 + $0x18] sm:$0xf0]  ;;  %v583_v43 = vor.u32 %v646_v40, %v582_v39  ;;  %v574_v45 = vld [vmem:[%s945_s29] sm:$0xf]  ;;  %v644_v46 = vld [vmem:[%s945_s29 + $0x4] sm:$0xf0]  ;;  %s430_s11 = scalar_lea.hbm %s1034_s3, %s659_s7 }
  0x2d   : > { %383 = vmatpush.bf16.msra.mxu0 %v615_v16  ;;  %v587_v44 = vor.u32 %v645_v41, %v584_v42  ;;  %v643_v47 = vld [vmem:[%s945_s29 + $0x4] sm:$0xf]  ;;  %v576_v48 = vld [vmem:[%s945_s29 + $0x8] sm:$0xf0]  ;;  %v575_v49 = vor.u32 %v644_v46, %v574_v45  ;;  %s249_s8 = scalar_lea.vmem [#allocation5], %s567_s6  ;;  %s433_s21 = sshll.u32 %s430_s11, 4  ;;  %s434_s21 = int_to_ptr.hbm [resolvable:$true] %s433_s21 }
  0x2e   : > { %397 = vmatpush.bf16.msra.mxu1 %v619_v17  ;;  %v579_v50 = vor.u32 %v643_v47, %v576_v48  ;;  %v642_v51 = vld [vmem:[%s1031_s0] sm:$0xff]  ;;  %s431_s18 = sshll.u32 %s249_s8, 4  ;;  %s414_s15 = scalar_lea.sflag [#allocation4], %s941_s19  ;;  %s432_s18 = int_to_ptr.vmem [resolvable:$true] %s431_s18 }
  0x2f   : > { %s772_s23 = sshra.s32 %s434_s21, 4  ;;  %s778_s28 = scalar_lea.hbm %s1034_s3, 64  ;;  %s773_s23 = int_to_ptr.hbm [resolvable:$true] %s772_s23 }
  0x30   : > { %s774_s29 = scalar_lea.hbm %s773_s23, 32  ;;  %p779_p7 = scmp.lt.s32.totalorder %s773_s23, %s1034_s3 }
  0x31   : > { %384 = vmatpush.bf16.msra.mxu0 %v607_v22  ;;  %292 = vperm.xlu0 %727, %v284_v36   ;;  %p775_p4 = scmp.ne.s32.totalorder %s773_s23, %s774_s29  ;;  %p780_p8 = scmp.lt.s32.totalorder %s778_s28, %s774_s29 }
  0x32   : > { %398 = vmatpush.bf16.msra.mxu1 %v611_v25 }
  0x33   : > { %p776_p5 = pnand %p775_p4, %p918_p9  ;;  %p781_p10 = por %p780_p8, %p779_p7 }
  0x35   : > { %385 = vmatpush.bf16.msra.mxu0 %v599_v30  ;;  %p777_p6 = pneg %p776_p5 }
  0x36   : > { %399 = vmatpush.bf16.msra.mxu1 %v603_v31 }
  0x37   : > { %p782_p13 = pnand %p781_p10, %p777_p6 }
  0x39   : > { %386 = vmatpush.bf16.msra.mxu0 %v591_v37 }
  0x3a   : > { %400 = vmatpush.bf16.msra.mxu1 %v595_v38 }
  0x3d   : > { %387 = vmatpush.bf16.msra.mxu0 %v583_v43 }
  0x3e   : > { %401 = vmatpush.bf16.msra.mxu1 %v587_v44 }
  0x41   : > { %388 = vmatpush.bf16.msra.mxu0 %v575_v49 }
  0x42   : > { %402 = vmatpush.bf16.msra.mxu1 %v579_v50 }
  0x44   : > { %389 = vmatmul.bf16.vlgmr.msra.gmra.mxu0 %v642_v51 }
  0x45   : > { %403 = vmatmul.bf16.vlgmr.msra.gmra.mxu1 %v642_v51 }
  0x9b   : > { %v288_v52 = vpop.permute.xlu0 %287 }
  0xa3   : > { %v293_v57 = vpop.permute.xlu0 %292 }
  0xc1   : > { %v390_v53 = vpop.f32.mrf.mxu0 }
  0xc2   : > { %v391_v54 = vadd.f32 %v390_v53, %v288_v52  ;;  %v404_v55 = vpop.f32.mrf.mxu1 }
  0xc3   : > { %v405_v56 = vadd.f32 %v404_v55, %v288_v52 }
  0xc4   : > { %409 = vst [vmem:[%s249_s8] sm:$0xff] %v391_v54 }
  0xc5   : > { %410 = vst [vmem:[%s249_s8 + $0x8] sm:$0xff] %v405_v56 }
  0xc9   : > { %v392_v58 = vpop.f32.mrf.mxu0 }
  0xca   : > { %v393_v59 = vadd.f32 %v392_v58, %v293_v57  ;;  %v406_v60 = vpop.f32.mrf.mxu1 }
  0xcb   : > { %v407_v61 = vadd.f32 %v406_v60, %v293_v57 }
  0xcc   : > { %411 = vst [vmem:[%s249_s8 + $0x10] sm:$0xff] %v393_v59 }
  0xcd   : > { %412 = vst [vmem:[%s249_s8 + $0x18] sm:$0xff] %v407_v61 }
  0xce   : > { %785 = shalt.err (!%p782_p13)
}
  0xcf   : > { %s845_s19 = smov 256   ;;  %s846_s5 = smov 16  }
  0xd0   : > { %662 = dma.vmem_to_hbm [thread:$0]  (%p918_p9), %s432_s18, 512, %s434_s21, %s414_s15, %s845_s19, %s845_s19, %s846_s5  }
  0xd1 PF: > { %s448_s6 = sand.u32 1, %s820_s12   ;;  %p669_p0 = pnand %p561_p12, %p925_p11 }
  0xd2   : > { %s449_s7 = scalar_lea.sflag [#allocation4], %s448_s6 }
  0xd3   : > { %p670_p1 = pneg %p669_p0 }
  0xd5   : > { %815 = dma.done.wait (%p670_p1), %s449_s7, 512  }
  0xd6   : > { %817 = vsyncadd (%p670_p1), %s449_s7, 4294966784  ;;  %s19_s17 = sadd.s32 1, %s840_s17   ;;  %s1039_s12 = smov %s824_s13 }
  0xd7   : > { %p16_p2 = scmp.ge.s32.totalorder %s19_s17, 4   ;;  %s1040_s13 = smov %s828_s14 }
  0xd8   : > { %s1041_s14 = smov %s923_s26  ;;  %s1042_s15 = smov %s836_s16 }
  0xd9   : > { %s1043_s16 = smov %s1045_s20  ;;  %18 = sbr.rel (!%p16_p2) target bundleno = 6 (0x6), region = 83 }
  0xde   :  { %455 = vsyncpa [#allocation3], 1 }
  0xdf   :  { %457 = vsyncpa [#allocation3 + $0x1], 1 }
  0xe0   :  { %458 = vsyncpa [#allocation4], 1 }
  0xe1   :  { %460 = vsyncpa [#allocation4 + $0x1], 1 }

</bundles_post_ra>
